<compile_context>
chip_gen: v7x
topology: tpu7x:2x2x1
jax: 0.10.0
libtpu: 0.0.40
codegen_flags: <defaults>
</compile_context>

<pallas_src>
import jax
import jax.numpy as jnp
from jax.experimental import pallas as pl
from jax.experimental.pallas import tpu as pltpu

LANE = 128                 # packed row width (lane dimension)
DIM_IN = 2                 # [price, i_t]
DIM_OUT = 1
HIDDEN = 32                # both hidden widths (dim_h = (32, 32))
PACK = LANE // HIDDEN      # 4 samples packed per 128-lane row
PACKED_IN = PACK * DIM_IN  # 8 input lanes per packed row
TB_MAX = 2048              # max batch tile, in original x rows
ROW_ALIGN = 8 * PACK       # TB multiple of 32 -> packed tile rows multiple of 8


def _mlp_kernel(xp_ref, w1_ref, b1_ref, w2_ref, b2_ref, w3_ref, b3_ref, o_ref):
    # xp_ref: (TBr, 8)    f32  -- 4 samples per row, 2 features each
    # w1_ref: (8, 128)    bf16 block-diagonal (4 copies of w1^T)
    # b1_ref: (1, 128)    f32  (b1 tiled 4x)
    # w2_ref: (128, 128)  bf16 block-diagonal (4 copies of w2^T)
    # b2_ref: (1, 128)    f32  (b2 tiled 4x)
    # w3_ref: (128, 128)  bf16 (block-diag w3^T in the first 4 columns, rest 0)
    # b3_ref: (1, 1)      f32  scalar in SMEM
    # o_ref : (TBr, 4)    f32  -- one output per packed sample slot

    # Layer 1 on the MXU (bf16 operands, f32 accumulate).  In the packed
    # layout K=8 costs the same vmatmul pushes as K=128, so this beats VPU
    # broadcast-MACs and keeps the XLU out of the bundle.
    h = jnp.dot(xp_ref[...].astype(jnp.bfloat16), w1_ref[...],
                preferred_element_type=jnp.float32) + b1_ref[...]
    h = jnp.maximum(h, 0.0)                                   # f32 VPU

    # Layer 2 on the MXU: block-diagonal weights -> all 128 lanes real work.
    h = jnp.dot(h.astype(jnp.bfloat16), w2_ref[...],
                preferred_element_type=jnp.float32) + b2_ref[...]
    h = jnp.maximum(h, 0.0)                                   # f32 VPU

    # Layer 3 folded into one more MXU pass (only the first PACK columns of
    # w3_ref are non-zero) instead of a cross-lane XLU reduce.
    o = jnp.dot(h.astype(jnp.bfloat16), w3_ref[...],
                preferred_element_type=jnp.float32)
    o_ref[...] = o[:, 0:PACK] + b3_ref[0, 0]                  # narrow writeback


def _block_diag(block, copies):
    r, c = block.shape
    out = jnp.zeros((r * copies, c * copies), block.dtype)
    for i in range(copies):
        out = out.at[i * r:(i + 1) * r, i * c:(i + 1) * c].set(block)
    return out


def prepare_params(params):
    """One-time prep: torch-style [out, in] weights -> packed block-diagonal
    bf16 MXU operands; biases stay f32; b3 is a (1,1) SMEM scalar."""
    (w1, b1), (w2, b2), (w3, b3) = params["l1"], params["l2"], params["l3"]
    assert w1.shape == (HIDDEN, DIM_IN)
    assert w2.shape == (HIDDEN, HIDDEN)
    assert w3.shape == (DIM_OUT, HIDDEN)

    w1_p = _block_diag(w1.T.astype(jnp.float32), PACK).astype(jnp.bfloat16)  # (8, 128)
    b1_p = jnp.tile(b1.astype(jnp.float32), PACK)[None, :]                   # (1, 128)
    w2_p = _block_diag(w2.T.astype(jnp.float32), PACK).astype(jnp.bfloat16)  # (128, 128)
    b2_p = jnp.tile(b2.astype(jnp.float32), PACK)[None, :]                   # (1, 128)
    w3_bd = _block_diag(w3.T.astype(jnp.float32), PACK)                      # (128, 4)
    w3_p = jnp.pad(w3_bd, ((0, 0), (0, LANE - PACK))).astype(jnp.bfloat16)   # (128, 128)
    b3_p = b3.astype(jnp.float32).reshape(1, 1)                              # (1, 1)
    return (w1_p, b1_p, w2_p, b2_p, w3_p, b3_p)


@jax.jit
def neural_net_forward(x, prepared):
    """x: [N, 2]; prepared: output of prepare_params. Returns [N, 1] f32."""
    w1_p, b1_p, w2_p, b2_p, w3_p, b3_p = prepared
    x = x.astype(jnp.float32)              # mirrors x.float() in the torch forward
    N = x.shape[0]

    # Adaptive batch tile (multiple of 32 original rows so the packed tile has
    # a multiple-of-8 sublane count).  For N <= TB_MAX we split into two tiles
    # when possible so the "parallel" grid axis can shard across both v7x
    # TensorCores; TB_MAX=2048 keeps the ~600-cycle per-step overhead small.
    # Note: every distinct N retraces/recompiles -- bucket N upstream if it
    # varies call-to-call in production.
    if N > TB_MAX:
        TB = TB_MAX
    else:
        half = (N + 1) // 2
        TB = max(ROW_ALIGN, ((half + ROW_ALIGN - 1) // ROW_ALIGN) * ROW_ALIGN)
    N_pad = ((N + TB - 1) // TB) * TB
    TBr = TB // PACK                       # packed rows per tile

    x_p = jnp.pad(x, ((0, N_pad - N), (0, 0)))
    xp = x_p.reshape(N_pad // PACK, PACKED_IN)   # 4 samples per 8-lane row

    full = lambda i: (0, 0)
    out_p = pl.pallas_call(
        _mlp_kernel,
        out_shape=jax.ShapeDtypeStruct((N_pad // PACK, PACK), jnp.float32),
        grid_spec=pltpu.PrefetchScalarGridSpec(
            num_scalar_prefetch=0,
            grid=(N_pad // TB,),
            in_specs=[
                pl.BlockSpec((TBr, PACKED_IN), lambda i: (i, 0)),    # packed x tile
                pl.BlockSpec((PACKED_IN, LANE), full),               # W1 (bf16)
                pl.BlockSpec((1, LANE), full),                       # b1
                pl.BlockSpec((LANE, LANE), full),                    # W2 (bf16)
                pl.BlockSpec((1, LANE), full),                       # b2
                pl.BlockSpec((LANE, LANE), full),                    # W3 (bf16)
                pl.BlockSpec(memory_space=pltpu.MemorySpace.SMEM),   # b3 scalar
            ],
            out_specs=pl.BlockSpec((TBr, PACK), lambda i: (i, 0)),
        ),
        compiler_params=pltpu.CompilerParams(
            dimension_semantics=("parallel",)),
    )(xp, w1_p, b1_p, w2_p, b2_p, w3_p, b3_p)

    return out_p.reshape(N_pad, DIM_OUT)[:N, :]


def _init_linear(key, fan_in, fan_out):
    # Deterministic init mimicking torch.nn.Linear default: U(+-1/sqrt(fan_in))
    kw, kb = jax.random.split(key)
    bound = 1.0 / jnp.sqrt(jnp.float32(fan_in))
    w = jax.random.uniform(kw, (fan_out, fan_in), jnp.float32, -bound, bound)
    b = jax.random.uniform(kb, (fan_out,), jnp.float32, -bound, bound)
    return w, b


if __name__ == "__main__":
    key = jax.random.PRNGKey(0)
    k_x, k1, k2, k3 = jax.random.split(key, 4)

    # Synthetic stand-in for torch.stack([price, i_t], dim=1): [N, 2].
    # N=600 exercises multi-tile batching (grid of 2 at TB=320) plus padding.
    N = 600
    dim_h = (HIDDEN, HIDDEN)
    x = jax.random.normal(k_x, (N, DIM_IN), jnp.float32)

    params = {
        "l1": _init_linear(k1, DIM_IN, dim_h[0]),
        "l2": _init_linear(k2, dim_h[0], dim_h[1]),
        "l3": _init_linear(k3, dim_h[1], DIM_OUT),
    }
    prepared = prepare_params(params)

    out = neural_net_forward(x, prepared)
    out = jax.block_until_ready(out)

    # Reference checks:
    #  * tight check against a reference that emulates the kernel's bf16
    #    MXU operands (f32 accumulate) -- validates packing/indexing exactly;
    #  * loose check against the exact f32 module semantics (tolerance relaxed
    #    for the bf16 mantissa, per the performance review).
    def ref(x, params, mxu_dtype):
        h = x.astype(jnp.float32)
        for name in ("l1", "l2", "l3"):
            w, b = params[name]
            hq = h.astype(mxu_dtype).astype(jnp.float32)
            wq = w.T.astype(mxu_dtype).astype(jnp.float32)
            h = hq @ wq + b
            if name != "l3":
                h = jnp.maximum(h, 0.0)
        return h

    exact = ref(x, params, jnp.float32)
    emulated = ref(x, params, jnp.bfloat16)

    assert out.shape == (N, DIM_OUT)
    assert jnp.allclose(out, emulated, atol=1e-3, rtol=1e-3), (
        float(jnp.max(jnp.abs(out - emulated))))
    assert jnp.allclose(out, exact, atol=1e-1, rtol=1e-1), (
        float(jnp.max(jnp.abs(out - exact))))
    print("KERNEL_OK")
</pallas_src>

<mosaic_0001>
module attributes {stable_mosaic.version = 11 : i64} {
  func.func @_mlp_kernel(%arg0: i32, %arg1: memref<80x8xf32, #tpu.memory_space<vmem>>, %arg2: memref<8x128xbf16, #tpu.memory_space<vmem>>, %arg3: memref<1x128xf32, #tpu.memory_space<vmem>>, %arg4: memref<128x128xbf16, #tpu.memory_space<vmem>>, %arg5: memref<1x128xf32, #tpu.memory_space<vmem>>, %arg6: memref<128x128xbf16, #tpu.memory_space<vmem>>, %arg7: memref<1x1xf32, #tpu.memory_space<smem>>, %arg8: memref<80x4xf32, #tpu.memory_space<vmem>>) attributes {dimension_semantics = [#tpu.dimension_semantics<parallel>], iteration_bounds = array<i64: 2>, scalar_prefetch = 0 : i64, scratch_operands = 0 : i64, tpu.core_type = #tpu.core_type<tc>, window_params = [{transform_indices = @transform_0, window_bounds = array<i64: 80, 8>}, {pipeline_mode = #tpu.pipeline_mode<synchronous>, transform_indices = @transform_1, window_bounds = array<i64: 8, 128>}, {pipeline_mode = #tpu.pipeline_mode<synchronous>, transform_indices = @transform_2, window_bounds = array<i64: 1, 128>}, {pipeline_mode = #tpu.pipeline_mode<synchronous>, transform_indices = @transform_3, window_bounds = array<i64: 128, 128>}, {pipeline_mode = #tpu.pipeline_mode<synchronous>, transform_indices = @transform_4, window_bounds = array<i64: 1, 128>}, {pipeline_mode = #tpu.pipeline_mode<synchronous>, transform_indices = @transform_5, window_bounds = array<i64: 128, 128>}, {transform_indices = @transform_6, window_bounds = array<i64: 1, 1>}, {transform_indices = @transform_7, window_bounds = array<i64: 80, 4>}]} {
    %c0 = arith.constant 0 : index
    %c0_0 = arith.constant 0 : index
    %0 = vector.load %arg1[%c0, %c0_0] : memref<80x8xf32, #tpu.memory_space<vmem>>, vector<80x8xf32>
    %1 = arith.truncf %0 : vector<80x8xf32> to vector<80x8xbf16>
    %c0_1 = arith.constant 0 : index
    %c0_2 = arith.constant 0 : index
    %2 = vector.load %arg2[%c0_1, %c0_2] : memref<8x128xbf16, #tpu.memory_space<vmem>>, vector<8x128xbf16>
    %cst = arith.constant dense<0.000000e+00> : vector<80x128xf32>
    %3 = tpu.matmul %1, %2, %cst {dimension_numbers = #tpu.dot_dimension_numbers<[1], [0], [0], [1], [0, 0, 1, 1], [], []>} : vector<80x8xbf16>, vector<8x128xbf16>, vector<80x128xf32> -> vector<80x128xf32>
    %c0_3 = arith.constant 0 : index
    %c0_4 = arith.constant 0 : index
    %4 = vector.load %arg3[%c0_3, %c0_4] : memref<1x128xf32, #tpu.memory_space<vmem>>, vector<1x128xf32>
    %5 = vector.broadcast %4 : vector<1x128xf32> to vector<80x128xf32>
    %6 = arith.addf %3, %5 : vector<80x128xf32>
    %cst_5 = arith.constant 0.000000e+00 : f32
    %7 = vector.broadcast %cst_5 : f32 to vector<80x128xf32>
    %8 = arith.maximumf %6, %7 : vector<80x128xf32>
    %9 = arith.truncf %8 : vector<80x128xf32> to vector<80x128xbf16>
    %c0_6 = arith.constant 0 : index
    %c0_7 = arith.constant 0 : index
    %10 = vector.load %arg4[%c0_6, %c0_7] : memref<128x128xbf16, #tpu.memory_space<vmem>>, vector<128x128xbf16>
    %cst_8 = arith.constant dense<0.000000e+00> : vector<80x128xf32>
    %11 = tpu.matmul %9, %10, %cst_8 {dimension_numbers = #tpu.dot_dimension_numbers<[1], [0], [0], [1], [0, 0, 1, 1], [], []>} : vector<80x128xbf16>, vector<128x128xbf16>, vector<80x128xf32> -> vector<80x128xf32>
    %c0_9 = arith.constant 0 : index
    %c0_10 = arith.constant 0 : index
    %12 = vector.load %arg5[%c0_9, %c0_10] : memref<1x128xf32, #tpu.memory_space<vmem>>, vector<1x128xf32>
    %13 = vector.broadcast %12 : vector<1x128xf32> to vector<80x128xf32>
    %14 = arith.addf %11, %13 : vector<80x128xf32>
    %cst_11 = arith.constant 0.000000e+00 : f32
    %15 = vector.broadcast %cst_11 : f32 to vector<80x128xf32>
    %16 = arith.maximumf %14, %15 : vector<80x128xf32>
    %17 = arith.truncf %16 : vector<80x128xf32> to vector<80x128xbf16>
    %c0_12 = arith.constant 0 : index
    %c0_13 = arith.constant 0 : index
    %18 = vector.load %arg6[%c0_12, %c0_13] : memref<128x128xbf16, #tpu.memory_space<vmem>>, vector<128x128xbf16>
    %cst_14 = arith.constant dense<0.000000e+00> : vector<80x128xf32>
    %19 = tpu.matmul %17, %18, %cst_14 {dimension_numbers = #tpu.dot_dimension_numbers<[1], [0], [0], [1], [0, 0, 1, 1], [], []>} : vector<80x128xbf16>, vector<128x128xbf16>, vector<80x128xf32> -> vector<80x128xf32>
    %20 = vector.extract_strided_slice %19 {offsets = [0, 0], sizes = [80, 4], strides = [1, 1]} : vector<80x128xf32> to vector<80x4xf32>
    %c0_15 = arith.constant 0 : index
    %c0_16 = arith.constant 0 : index
    %21 = memref.load %arg7[%c0_15, %c0_16] : memref<1x1xf32, #tpu.memory_space<smem>>
    %22 = vector.broadcast %21 : f32 to vector<80x4xf32>
    %23 = arith.addf %20, %22 : vector<80x4xf32>
    %c0_17 = arith.constant 0 : index
    %c0_18 = arith.constant 0 : index
    %24 = vector.load %arg8[%c0_17, %c0_18] : memref<80x4xf32, #tpu.memory_space<vmem>>, vector<80x4xf32>
    tpu.vector_store %arg8[%c0_17, %c0_18], %23 {strides = array<i32>} : memref<80x4xf32, #tpu.memory_space<vmem>>, vector<80x4xf32>,
    return
  }
  func.func @transform_0(%arg0: i32) -> (i32, i32) {
    %c0_i32 = arith.constant 0 : i32
    %c0_i32_0 = arith.constant 0 : i32
    return %arg0, %c0_i32 : i32, i32
  }
  func.func @transform_1(%arg0: i32) -> (i32, i32) {
    %c0_i32 = arith.constant 0 : i32
    %c0_i32_0 = arith.constant 0 : i32
    %c0_i32_1 = arith.constant 0 : i32
    return %c0_i32, %c0_i32_0 : i32, i32
  }
  func.func @transform_2(%arg0: i32) -> (i32, i32) {
    %c0_i32 = arith.constant 0 : i32
    %c0_i32_0 = arith.constant 0 : i32
    %c0_i32_1 = arith.constant 0 : i32
    return %c0_i32, %c0_i32_0 : i32, i32
  }
  func.func @transform_3(%arg0: i32) -> (i32, i32) {
    %c0_i32 = arith.constant 0 : i32
    %c0_i32_0 = arith.constant 0 : i32
    %c0_i32_1 = arith.constant 0 : i32
    return %c0_i32, %c0_i32_0 : i32, i32
  }
  func.func @transform_4(%arg0: i32) -> (i32, i32) {
    %c0_i32 = arith.constant 0 : i32
    %c0_i32_0 = arith.constant 0 : i32
    %c0_i32_1 = arith.constant 0 : i32
    return %c0_i32, %c0_i32_0 : i32, i32
  }
  func.func @transform_5(%arg0: i32) -> (i32, i32) {
    %c0_i32 = arith.constant 0 : i32
    %c0_i32_0 = arith.constant 0 : i32
    %c0_i32_1 = arith.constant 0 : i32
    return %c0_i32, %c0_i32_0 : i32, i32
  }
  func.func @transform_6(%arg0: i32) -> (i32, i32) {
    %c0_i32 = arith.constant 0 : i32
    %c0_i32_0 = arith.constant 0 : i32
    %c0_i32_1 = arith.constant 0 : i32
    return %c0_i32, %c0_i32_0 : i32, i32
  }
  func.func @transform_7(%arg0: i32) -> (i32, i32) {
    %c0_i32 = arith.constant 0 : i32
    %c0_i32_0 = arith.constant 0 : i32
    return %arg0, %c0_i32 : i32, i32
  }
}

</mosaic_0001>

<bundles_post_ra>
// kernel: neural_net_forward.1
= control target key start
LH: loop header
LB: loop body
LE: loop exit
PB: predicated region body
PF: predicated region fallthrough
CT: control target
= control target key end

     0   :  { %s1029_s26 = smov 0   ;;  %s1197_s0 = inlined_call_operand.vmem [shape: f32[160,8], index: 0, kind: input, shape index: {}]   ;;  %s1198_s1 = inlined_call_operand.vmem [shape: bf16[8,128], index: 1, kind: input, shape index: {}]   ;;  %s1199_s2 = inlined_call_operand.vmem [shape: f32[1,128], index: 2, kind: input, shape index: {}]   ;;  %s1200_s3 = inlined_call_operand.vmem [shape: bf16[128,128], index: 3, kind: input, shape index: {}]   ;;  %s1201_s4 = inlined_call_operand.vmem [shape: f32[1,128], index: 4, kind: input, shape index: {}]   ;;  %s1202_s5 = inlined_call_operand.vmem [shape: bf16[128,128], index: 5, kind: input, shape index: {}]   ;;  %s1203_s6 = inlined_call_operand.<no memory space> [shape: f32[1,1], index: 6, kind: input, shape index: {}]   ;;  %s1204_s7 = inlined_call_operand.vmem [shape: f32[160,4], index: 7, kind: output, shape index: {}]  }
   0x1   :  { %12 = sst [smem:[#allocation2]] %s1203_s6 }
   0x2 LB: > { %s790_s27 = sadd.s32 4294967295, %s982_s26   ;;  %p794_p0 = scmp.ge.s32.totalorder %s982_s26, 1  ;;  %s982_s26 = sphi %s1029_s26, %s18_s26  }
   0x3   : > { %p239_p1 = scmp.lt.s32.totalorder %s982_s26, 3 }
   0x5   : > { %p240_p2 = pnand %p794_p0, %p239_p1 }
   0x6   : > { %v299_v0 = vld [vmem:[%s1198_s1] sm:$0xf] (!%p240_p2)  ;;  %vm323_vm0 = vcmask (!%p240_p2), 1043456   ;;  %s271_s6 = smul.u32 (!%p240_p2), 10, %s790_s27  ;;  %v984_v1 = vmov (!%p240_p2), 0.0   ;;  %vm985_vm1 = vmmov (!%p240_p2), 0  }
   0x7   : > { %243 = sbr.rel (%p240_p2) target bundleno = 709 (0x2c5), region = 48  ;;  %854 = vmatprep.subr.bf16.mxu0 (!%p240_p2), %v984_v1  ;;  %v325_v2 = vsel (!%p240_p2), %vm323_vm0, %v299_v0, 0  ;;  %856 = vmatprep.mubr.msk.bf16.mxu0 (!%p240_p2), %vm985_vm1, %v984_v1  ;;  %vm307_vm2 = vcmask (!%p240_p2), 64512   ;;  %v960_v6 = vld [vmem:[%s1200_s3] sm:$0xff] (!%p240_p2)   ;;  %v961_v12 = vld [vmem:[%s1200_s3 + $0x8] sm:$0xff] (!%p240_p2)   ;;  %v962_v14 = vld [vmem:[%s1200_s3 + $0x10] sm:$0xff] (!%p240_p2)  }
   0x8   : > { %855 = vmatpush3.bf16.msra.mxu0 (!%p240_p2), %v325_v2  ;;  %p272_p3 = scmp.lt.s32.totalorder (!%p240_p2), %s271_s6, 19  ;;  %948 = vmatprep.subr.bf16.mxu1 (!%p240_p2), %v984_v1  ;;  %v963_v18 = vld [vmem:[%s1200_s3 + $0x18] sm:$0xff] (!%p240_p2)   ;;  %v964_v19 = vld [vmem:[%s1200_s3 + $0x20] sm:$0xff] (!%p240_p2)   ;;  %v965_v23 = vld [vmem:[%s1200_s3 + $0x28] sm:$0xff] (!%p240_p2)   ;;  %s711_s27 = sld [smem:[#allocation2]] (!%p240_p2)  ;;  %vm723_vm3 = vcmask (!%p240_p2), 31744  }
   0x9   : > { %949 = vmatpush3.bf16.msra.mxu1 (!%p240_p2), %v325_v2  ;;  %872 = vmatprep.mubr.msk.bf16.mxu1 (!%p240_p2), %vm985_vm1, %v984_v1  ;;  %v966_v24 = vld [vmem:[%s1200_s3 + $0x30] sm:$0xff] (!%p240_p2)   ;;  %v967_v25 = vld [vmem:[%s1200_s3 + $0x38] sm:$0xff] (!%p240_p2)   ;;  %v968_v26 = vld [vmem:[%s1202_s5] sm:$0xff] (!%p240_p2)  }
   0xa   : > { %876 = vmatprep.subr.bf16.mxu1 (!%p240_p2), %v984_v1  ;;  %912 = vmatprep.subr.bf16.mxu0 (!%p240_p2), %v984_v1  ;;  %v969_v27 = vld [vmem:[%s1202_s5 + $0x8] sm:$0xff] (!%p240_p2)   ;;  %v970_v28 = vld [vmem:[%s1202_s5 + $0x10] sm:$0xff] (!%p240_p2)   ;;  %v971_v29 = vld [vmem:[%s1202_s5 + $0x18] sm:$0xff] (!%p240_p2)  }
   0xb   : > { %v972_v30 = vld [vmem:[%s1202_s5 + $0x20] sm:$0xff] (!%p240_p2)   ;;  %v973_v31 = vld [vmem:[%s1202_s5 + $0x28] sm:$0xff] (!%p240_p2)  }
   0xc   : > { %v797_v32 = vld [vmem:[%s1199_s2] ss:$0 sm:$0xff] (!%p240_p2) }
   0xe   : > { %s1206_s6 = smov (!%p272_p3, %s271_s6), 19 }
   0xf   : > { %s795_s30 = sshll.u32 %s1206_s6, 3 }
  0x10   : > { %s1056_s10 = scalar_lea.vmem %s1197_s0, %s795_s30  ;;  %s1172_s8 = scalar_lea.vmem %s1204_s7, %s795_s30 }
  0x11   : > { %v284_v3 = vld [vmem:[%s1056_s10] sm:$0xff]  ;;  %v285_v4 = vld [vmem:[%s1056_s10 + $0x8] sm:$0xff]  ;;  %v286_v7 = vld [vmem:[%s1056_s10 + $0x10] sm:$0xff] }
  0x12   : > { %v294_v5 = vpack.c.bf16 %v285_v4, %v284_v3  ;;  %v287_v8 = vld [vmem:[%s1056_s10 + $0x18] sm:$0xff]  ;;  %v292_v9 = vld [vmem:[%s1056_s10 + $0x40] sm:$0xff]  ;;  %v293_v10 = vld [vmem:[%s1056_s10 + $0x48] sm:$0xff] }
  0x13   : > { %v298_v11 = vpack.c.bf16 %v293_v10, %v292_v9  ;;  %v295_v13 = vpack.c.bf16 %v287_v8, %v286_v7  ;;  %v288_v15 = vld [vmem:[%s1056_s10 + $0x20] sm:$0xff]  ;;  %v289_v16 = vld [vmem:[%s1056_s10 + $0x28] sm:$0xff]  ;;  %v290_v20 = vld [vmem:[%s1056_s10 + $0x30] sm:$0xff] }
  0x14   : > { %857 = vmatmul.mubr.msk.bf16.vlgmr.msra.gmra.mrb[0].mxu0 %vm307_vm2, %v294_v5  ;;  %v296_v17 = vpack.c.bf16 %v289_v16, %v288_v15  ;;  %v291_v21 = vld [vmem:[%s1056_s10 + $0x38] sm:$0xff]  ;;  %v974_v15 = vld [vmem:[%s1202_s5 + $0x30] sm:$0xff]  }
  0x15   : > { %860 = vmatprep.mubr.msk.bf16.mxu0 %vm985_vm1, %v984_v1  ;;  %873 = vmatmul.mubr.msk.bf16.vlgmr.msra.gmra.mrb[0].mxu1 %vm307_vm2, %v298_v11  ;;  %v297_v22 = vpack.c.bf16 %v291_v21, %v290_v20  ;;  %v975_v16 = vld [vmem:[%s1202_s5 + $0x38] sm:$0xff]  }
  0x16   : > { %877 = vmatpush3.bf16.msra.mxu1 %v960_v6  ;;  %892 = vmatprep.mubr.msk.bf16.mxu1 %vm985_vm1, %v984_v1 }
  0x17   : > { %878 = vmatprep.subr.bf16.mxu1 %v984_v1  ;;  %913 = vmatpush3.bf16.msra.mxu0 %v968_v26 }
  0x18   : > { %914 = vmatprep.subr.bf16.mxu0 %v984_v1 }
  0x1a   : > { %879 = vmatpush3.bf16.msra.mxu1 %v961_v12 }
  0x1b   : > { %880 = vmatprep.subr.bf16.mxu1 %v984_v1  ;;  %915 = vmatpush3.bf16.msra.mxu0 %v969_v27 }
  0x1c   : > { %861 = vmatmul.mubr.msk.bf16.gmra.mrb[4].mxu0 %vm307_vm2, %v295_v13  ;;  %916 = vmatprep.subr.bf16.mxu0 %v984_v1 }
  0x1d   : > { %864 = vmatprep.mubr.msk.bf16.mxu0 %vm985_vm1, %v984_v1 }
  0x1e   : > { %881 = vmatpush3.bf16.msra.mxu1 %v962_v14 }
  0x1f   : > { %882 = vmatprep.subr.bf16.mxu1 %v984_v1  ;;  %917 = vmatpush3.bf16.msra.mxu0 %v970_v28 }
  0x20   : > { %918 = vmatprep.subr.bf16.mxu0 %v984_v1 }
  0x22   : > { %883 = vmatpush3.bf16.msra.mxu1 %v963_v18 }
  0x23   : > { %884 = vmatprep.subr.bf16.mxu1 %v984_v1  ;;  %919 = vmatpush3.bf16.msra.mxu0 %v971_v29 }
  0x24   : > { %865 = vmatmul.mubr.msk.bf16.gmra.mrb[8].mxu0 %vm307_vm2, %v296_v17  ;;  %920 = vmatprep.subr.bf16.mxu0 %v984_v1  ;;  %v803_v17 = vld [vmem:[%s1201_s4] ss:$0 sm:$0xff] }
  0x25   : > { %868 = vmatprep.mubr.msk.bf16.mxu0 %vm985_vm1, %v984_v1 }
  0x26   : > { %885 = vmatpush3.bf16.msra.mxu1 %v964_v19 }
  0x27   : > { %886 = vmatprep.subr.bf16.mxu1 %v984_v1  ;;  %921 = vmatpush3.bf16.msra.mxu0 %v972_v30 }
  0x28   : > { %922 = vmatprep.subr.bf16.mxu0 %v984_v1 }
  0x2a   : > { %887 = vmatpush3.bf16.msra.mxu1 %v965_v23 }
  0x2b   : > { %888 = vmatprep.subr.bf16.mxu1 %v984_v1  ;;  %923 = vmatpush3.bf16.msra.mxu0 %v973_v31 }
  0x2c   : > { %869 = vmatmul.mubr.msk.bf16.gmra.mrb[12].mxu0 %vm307_vm2, %v297_v22  ;;  %924 = vmatprep.subr.bf16.mxu0 %v984_v1 }
  0x2d   : > { %928 = vmatprep.mubr.msk.bf16.mxu0 %vm985_vm1, %v984_v1 }
  0x2e   : > { %889 = vmatpush3.bf16.msra.mxu1 %v966_v24 }
  0x2f   : > { %890 = vmatprep.subr.bf16.mxu1 %v984_v1  ;;  %925 = vmatpush3.bf16.msra.mxu0 %v974_v15 }
  0x30   : > { %926 = vmatprep.subr.bf16.mxu0 %v984_v1 }
  0x32   : > { %891 = vmatpush3.bf16.msra.mxu1 %v967_v25 }
  0x33   : > { %927 = vmatpush3.bf16.msra.mxu0 %v975_v16 }
  0xe7   : > { %v361_v33 = vpop.f32.mrb[0].mxu0 }
  0xe8   : > { %v362_v34 = vadd.f32 %v797_v32, %v361_v33  ;;  %v858_v35 = vpop.f32.mrb[1].mxu0  ;;  %v393_v39 = vpop.f32.mrb[0].mxu1 }
  0xe9   : > { %v364_v36 = vpop.f32.mrb[2].mxu0  ;;  %v394_v40 = vadd.f32 %v797_v32, %v393_v39  ;;  %v874_v41 = vpop.f32.mrb[1].mxu1 }
  0xea   : > { %v365_v37 = vadd.f32 %v797_v32, %v364_v36  ;;  %v859_v38 = vpop.f32.mrb[3].mxu0  ;;  %v400_v42 = vmax.f32 %v362_v34, 0.0  ;;  %v396_v44 = vpop.f32.mrb[2].mxu1 }
  0xeb   : > { %v408_v45 = vmax.f32 %v394_v40, 0.0  ;;  %v397_v46 = vadd.f32 %v797_v32, %v396_v44  ;;  %v875_v47 = vpop.f32.mrb[3].mxu1 }
  0xec   : > { %v401_v43 = vmax.f32 %v365_v37, 0.0 }
  0xed   : > { %v409_v50 = vmax.f32 %v397_v46, 0.0 }
  0xee   : > { %v410_v48 = vpack.c.bf16 %v401_v43, %v400_v42 }
  0xef   : > { %v369_v49 = vpop.f32.mrb[4].mxu0  ;;  %v414_v54 = vpack.c.bf16 %v409_v50, %v408_v45 }
  0xf0   : > { %v370_v51 = vadd.f32 %v797_v32, %v369_v49  ;;  %v862_v52 = vpop.f32.mrb[5].mxu0  ;;  %893 = vmatmul.mubr.bf16.vlgmr.msra.gmra.mrb[4].mxu1 %v410_v48 }
  0xf1   : > { %v372_v53 = vpop.f32.mrb[6].mxu0  ;;  %896 = vmatprep.mubr.msk.bf16.mxu1 %vm985_vm1, %v984_v1 }
  0xf2   : > { %v373_v55 = vadd.f32 %v797_v32, %v372_v53  ;;  %v863_v56 = vpop.f32.mrb[7].mxu0  ;;  %v402_v57 = vmax.f32 %v370_v51, 0.0 }
  0xf4   : > { %v403_v58 = vmax.f32 %v373_v55, 0.0 }
  0xf6   : > { %v411_v59 = vpack.c.bf16 %v403_v58, %v402_v57 }
  0xf7   : > { %v377_v60 = vpop.f32.mrb[8].mxu0 }
  0xf8   : > { %v378_v61 = vadd.f32 %v797_v32, %v377_v60  ;;  %v866_v62 = vpop.f32.mrb[9].mxu0  ;;  %897 = vmatmul.mubr.bf16.gmra.mrb[8].mxu1 %v411_v59 }
  0xf9   : > { %v380_v63 = vpop.f32.mrb[10].mxu0  ;;  %900 = vmatprep.mubr.msk.bf16.mxu1 %vm985_vm1, %v984_v1 }
  0xfa   : > { %v381_v0 = vadd.f32 %v797_v32, %v380_v63  ;;  %v867_v2 = vpop.f32.mrb[11].mxu0  ;;  %v404_v3 = vmax.f32 %v378_v61, 0.0  ;;  %v712_v63 = vstv %s711_s27 }
  0xfc   : > { %v405_v4 = vmax.f32 %v381_v0, 0.0 }
  0xfe   : > { %v412_v5 = vpack.c.bf16 %v405_v4, %v404_v3 }
  0xff   : > { %v385_v6 = vpop.f32.mrb[12].mxu0 }
 0x100   : > { %v386_v7 = vadd.f32 %v797_v32, %v385_v6  ;;  %v870_v8 = vpop.f32.mrb[13].mxu0  ;;  %901 = vmatmul.mubr.bf16.gmra.mrb[12].mxu1 %v412_v5 }
 0x101   : > { %v388_v9 = vpop.f32.mrb[14].mxu0  ;;  %904 = vmatprep.mubr.msk.bf16.mxu1 %vm985_vm1, %v984_v1 }
 0x102   : > { %v389_v10 = vadd.f32 %v797_v32, %v388_v9  ;;  %v871_v11 = vpop.f32.mrb[15].mxu0  ;;  %v406_v12 = vmax.f32 %v386_v7, 0.0 }
 0x104   : > { %v407_v13 = vmax.f32 %v389_v10, 0.0 }
 0x106   : > { %v413_v14 = vpack.c.bf16 %v407_v13, %v406_v12 }
 0x108   : > { %905 = vmatmul.mubr.bf16.gmra.mrb[16].mxu1 %v413_v14 }
 0x109   : > { %908 = vmatprep.mubr.msk.bf16.mxu1 %vm985_vm1, %v984_v1 }
 0x110   : > { %909 = vmatmul.mubr.bf16.gmra.mrb[20].mxu1 %v414_v54 }
 0x1c3   : > { %v520_v18 = vpop.f32.mrb[4].mxu1 }
 0x1c4   : > { %v521_v19 = vadd.f32 %v803_v17, %v520_v18  ;;  %v894_v20 = vpop.f32.mrb[5].mxu1 }
 0x1c5   : > { %v523_v21 = vpop.f32.mrb[6].mxu1 }
 0x1c6   : > { %v524_v22 = vadd.f32 %v803_v17, %v523_v21  ;;  %v895_v23 = vpop.f32.mrb[7].mxu1  ;;  %v559_v24 = vmax.f32 %v521_v19, 0.0 }
 0x1c8   : > { %v560_v25 = vmax.f32 %v524_v22, 0.0 }
 0x1ca   : > { %v569_v26 = vpack.c.bf16 %v560_v25, %v559_v24 }
 0x1cb   : > { %v528_v27 = vpop.f32.mrb[8].mxu1 }
 0x1cc   : > { %v529_v28 = vadd.f32 %v803_v17, %v528_v27  ;;  %v898_v29 = vpop.f32.mrb[9].mxu1  ;;  %929 = vmatmul.mubr.bf16.vlgmr.msra.gmra.mrb[16].mxu0 %v569_v26 }
 0x1cd   : > { %v531_v30 = vpop.f32.mrb[10].mxu1  ;;  %932 = vmatprep.mubr.msk.bf16.mxu0 %vm985_vm1, %v984_v1 }
 0x1ce   : > { %v532_v31 = vadd.f32 %v803_v17, %v531_v30  ;;  %v899_v32 = vpop.f32.mrb[11].mxu1  ;;  %v561_v33 = vmax.f32 %v529_v28, 0.0 }
 0x1d0   : > { %v562_v34 = vmax.f32 %v532_v31, 0.0 }
 0x1d2   : > { %v570_v35 = vpack.c.bf16 %v562_v34, %v561_v33 }
 0x1d3   : > { %v536_v36 = vpop.f32.mrb[12].mxu1 }
 0x1d4   : > { %v537_v37 = vadd.f32 %v803_v17, %v536_v36  ;;  %v902_v38 = vpop.f32.mrb[13].mxu1  ;;  %933 = vmatmul.mubr.bf16.gmra.mrb[20].mxu0 %v570_v35 }
 0x1d5   : > { %v539_v39 = vpop.f32.mrb[14].mxu1  ;;  %936 = vmatprep.mubr.msk.bf16.mxu0 %vm985_vm1, %v984_v1 }
 0x1d6   : > { %v540_v40 = vadd.f32 %v803_v17, %v539_v39  ;;  %v903_v41 = vpop.f32.mrb[15].mxu1  ;;  %v563_v42 = vmax.f32 %v537_v37, 0.0 }
 0x1d8   : > { %v564_v43 = vmax.f32 %v540_v40, 0.0 }
 0x1da   : > { %v571_v44 = vpack.c.bf16 %v564_v43, %v563_v42 }
 0x1db   : > { %v544_v45 = vpop.f32.mrb[16].mxu1 }
 0x1dc   : > { %v545_v46 = vadd.f32 %v803_v17, %v544_v45  ;;  %v906_v47 = vpop.f32.mrb[17].mxu1  ;;  %937 = vmatmul.mubr.bf16.gmra.mrb[24].mxu0 %v571_v44 }
 0x1dd   : > { %v547_v48 = vpop.f32.mrb[18].mxu1  ;;  %940 = vmatprep.mubr.msk.bf16.mxu0 %vm985_vm1, %v984_v1 }
 0x1de   : > { %v548_v49 = vadd.f32 %v803_v17, %v547_v48  ;;  %v907_v50 = vpop.f32.mrb[19].mxu1  ;;  %v565_v51 = vmax.f32 %v545_v46, 0.0 }
 0x1e0   : > { %v566_v52 = vmax.f32 %v548_v49, 0.0 }
 0x1e2   : > { %v572_v53 = vpack.c.bf16 %v566_v52, %v565_v51 }
 0x1e3   : > { %v552_v54 = vpop.f32.mrb[20].mxu1 }
 0x1e4   : > { %v553_v55 = vadd.f32 %v803_v17, %v552_v54  ;;  %v910_v56 = vpop.f32.mrb[21].mxu1  ;;  %941 = vmatmul.mubr.bf16.gmra.mrb[28].mxu0 %v572_v53 }
 0x1e5   : > { %v555_v57 = vpop.f32.mrb[22].mxu1  ;;  %944 = vmatprep.mubr.msk.bf16.mxu0 %vm985_vm1, %v984_v1 }
 0x1e6   : > { %v556_v58 = vadd.f32 %v803_v17, %v555_v57  ;;  %v911_v59 = vpop.f32.mrb[23].mxu1  ;;  %v567_v60 = vmax.f32 %v553_v55, 0.0 }
 0x1e8   : > { %v568_v61 = vmax.f32 %v556_v58, 0.0 }
 0x1ea   : > { %v573_v62 = vpack.c.bf16 %v568_v61, %v567_v60 }
 0x1ec   : > { %945 = vmatmul.mubr.bf16.gmra.mrb[32].mxu0 %v573_v62 }
 0x29f   : > { %v672_v0 = vpop.f32.mrb[16].mxu0 }
 0x2a0   : > { %v713_v1 = vadd.f32 %v712_v63, %v672_v0  ;;  %v930_v2 = vpop.f32.mrb[17].mxu0 }
 0x2a1   : > { %v675_v3 = vpop.f32.mrb[18].mxu0 }
 0x2a2   : > { %724 = vst.msk [vmem:[%s1172_s8] sm:$0xff] %vm723_vm3, %v713_v1  ;;  %v714_v4 = vadd.f32 %v712_v63, %v675_v3  ;;  %v931_v5 = vpop.f32.mrb[19].mxu0 }
 0x2a4   : > { %725 = vst.msk [vmem:[%s1172_s8 + $0x8] sm:$0xff] %vm723_vm3, %v714_v4 }
 0x2a7   : > { %v680_v6 = vpop.f32.mrb[20].mxu0 }
 0x2a8   : > { %v715_v7 = vadd.f32 %v712_v63, %v680_v6  ;;  %v934_v8 = vpop.f32.mrb[21].mxu0 }
 0x2a9   : > { %v683_v9 = vpop.f32.mrb[22].mxu0 }
 0x2aa   : > { %726 = vst.msk [vmem:[%s1172_s8 + $0x10] sm:$0xff] %vm723_vm3, %v715_v7  ;;  %v716_v10 = vadd.f32 %v712_v63, %v683_v9  ;;  %v935_v11 = vpop.f32.mrb[23].mxu0 }
 0x2ac   : > { %727 = vst.msk [vmem:[%s1172_s8 + $0x18] sm:$0xff] %vm723_vm3, %v716_v10 }
 0x2af   : > { %v688_v12 = vpop.f32.mrb[24].mxu0 }
 0x2b0   : > { %v717_v13 = vadd.f32 %v712_v63, %v688_v12  ;;  %v938_v14 = vpop.f32.mrb[25].mxu0 }
 0x2b1   : > { %v691_v15 = vpop.f32.mrb[26].mxu0 }
 0x2b2   : > { %728 = vst.msk [vmem:[%s1172_s8 + $0x20] sm:$0xff] %vm723_vm3, %v717_v13  ;;  %v718_v16 = vadd.f32 %v712_v63, %v691_v15  ;;  %v939_v17 = vpop.f32.mrb[27].mxu0 }
 0x2b4   : > { %729 = vst.msk [vmem:[%s1172_s8 + $0x28] sm:$0xff] %vm723_vm3, %v718_v16 }
 0x2b7   : > { %v696_v18 = vpop.f32.mrb[28].mxu0 }
 0x2b8   : > { %v719_v19 = vadd.f32 %v712_v63, %v696_v18  ;;  %v942_v20 = vpop.f32.mrb[29].mxu0 }
 0x2b9   : > { %v699_v21 = vpop.f32.mrb[30].mxu0 }
 0x2ba   : > { %730 = vst.msk [vmem:[%s1172_s8 + $0x30] sm:$0xff] %vm723_vm3, %v719_v19  ;;  %v720_v22 = vadd.f32 %v712_v63, %v699_v21  ;;  %v943_v23 = vpop.f32.mrb[31].mxu0 }
 0x2bc   : > { %731 = vst.msk [vmem:[%s1172_s8 + $0x38] sm:$0xff] %vm723_vm3, %v720_v22 }
 0x2bf   : > { %v704_v24 = vpop.f32.mrb[32].mxu0 }
 0x2c0   : > { %v721_v25 = vadd.f32 %v712_v63, %v704_v24  ;;  %v946_v26 = vpop.f32.mrb[33].mxu0 }
 0x2c1   : > { %v707_v27 = vpop.f32.mrb[34].mxu0 }
 0x2c2   : > { %732 = vst.msk [vmem:[%s1172_s8 + $0x40] sm:$0xff] %vm723_vm3, %v721_v25  ;;  %v722_v28 = vadd.f32 %v712_v63, %v707_v27  ;;  %v947_v29 = vpop.f32.mrb[35].mxu0 }
 0x2c4   : > { %733 = vst.msk [vmem:[%s1172_s8 + $0x48] sm:$0xff] %vm723_vm3, %v722_v28 }
 0x2c5 PF: > { %s18_s26 = sadd.s32 1, %s982_s26  }
 0x2c6   : > { %p15_p4 = scmp.ge.s32.totalorder %s18_s26, 4  }
 0x2c8   :  { %17 = sbr.rel (!%p15_p4) target bundleno = 2 (0x2), region = 78 }

</bundles_post_ra>
